<compile_context>
chip_gen: v6e
topology: v6e:2x2x1
jax: 0.10.0
libtpu: 0.0.40
codegen_flags: <defaults>
</compile_context>

<pallas_src>
import jax
import jax.numpy as jnp
import numpy as np
from jax import lax
from jax.experimental import pallas as pl
from jax.experimental.pallas import tpu as pltpu

N_LAYERS = 4
NUM_CLASSES = 2

MiB = 1024 * 1024
SMALL_PATH_MAX_BYTES = 1 * MiB          # below this, the no-grid path is cheaper
DEEP_BUFFER_BELOW_BYTES = 2 * MiB       # Buffered(3) only for small streaming blocks


# ---------------------------------------------------------------------------
# Hardware profile / generation-aware budgets.
# ---------------------------------------------------------------------------
def _tpu_memory_profile():
    """Return (vmem_capacity_bytes, tensorcores_per_chip) with safe fallbacks."""
    vmem_cap = 64 * MiB                 # conservative default (v7x per-TC VMEM)
    try:
        cap = getattr(pltpu.get_tpu_info(), "vmem_capacity_bytes", None)
        if cap:
            vmem_cap = int(cap)
    except Exception:
        pass
    n_cores = 1
    try:
        kind = jax.devices()[0].device_kind.lower()
        if "v7" in kind or "7x" in kind:
            n_cores = 2                 # v7x: 2 TensorCores per chip
    except Exception:
        pass
    return vmem_cap, n_cores


def _derive_budgets(vmem_cap_bytes, is_v7x):
    """Generation-aware (hid_block_budget, scoped_vmem_limit).

    v5e/v6e (128 MiB VMEM): ~18 MiB streaming blocks, 64 MiB scoped limit.
    v7x      (64 MiB / TC): ~13 MiB blocks, 48 MiB scoped limit, keeping
    2x(hid block) + resident pool/weights/acc comfortably under the limit.
    """
    if is_v7x:
        vmem_cap_bytes = min(vmem_cap_bytes, 64 * MiB)   # per-TC VMEM on v7x
    vmem_limit = min(64 * MiB, (3 * vmem_cap_bytes) // 4)
    budget = min(20 * MiB, max(2 * MiB, (vmem_limit - 8 * MiB) // 3))
    return budget, vmem_limit


# ---------------------------------------------------------------------------
# Kernels.
# ---------------------------------------------------------------------------
# Contract the last axis of both operands: [M, H] x [C, H] -> [M, C].
_DN_NT = (((1,), (1,)), ((), ()))


def _make_small_kernel(layer_off, n_layers):
    """No-grid fast path: whole problem resident in VMEM, single invocation.
    The last-n_layers selection happens in-kernel (static ds) so there is no
    wrapper-side HBM slice copy of the hidden-state slab."""
    def kernel(hid_ref, pool_ref, w_tok_ref, w_pool_ref, b_ref, out_ref):
        hid = hid_ref[pl.ds(layer_off, n_layers), :, :, :]   # [n_layers, B, S, H]
        token = jnp.sum(hid, axis=0, dtype=jnp.float32)      # sum over layers
        token = jnp.sum(token, axis=1)                        # sum over seq (1/S in w_tok)
        pool = pool_ref[...].astype(jnp.float32)
        logits = (lax.dot_general(token, w_tok_ref[...], _DN_NT,
                                  preferred_element_type=jnp.float32)
                  + lax.dot_general(pool, w_pool_ref[...], _DN_NT,
                                    preferred_element_type=jnp.float32)
                  + b_ref[...])
        out_ref[...] = logits.astype(out_ref.dtype)
    return kernel


def _head_kernel_tiled(hid_ref, pool_ref, w_tok_ref, w_pool_ref, b_ref, out_ref, acc_ref):
    """grid = (batch_block, layer, seq_block); layer/seq are reduction axes."""
    l = pl.program_id(1)
    s = pl.program_id(2)

    @pl.when(jnp.logical_and(l == 0, s == 0))
    def _():
        acc_ref[...] = jnp.zeros_like(acc_ref)

    # Streaming (layer, seq) reduction.  The cast is fused into the f32
    # accumulating reduce -> no full-tile f32 temp next to the bf16 block.
    acc_ref[...] += jnp.sum(hid_ref[...], axis=1, dtype=jnp.float32)   # -> [tB, H]

    # Epilogue once per batch block: tiny C=2 matmuls + bias + store.
    @pl.when(jnp.logical_and(l == pl.num_programs(1) - 1, s == pl.num_programs(2) - 1))
    def _():
        pool = pool_ref[...].astype(jnp.float32)
        logits = (lax.dot_general(acc_ref[...], w_tok_ref[...], _DN_NT,
                                  preferred_element_type=jnp.float32)
                  + lax.dot_general(pool, w_pool_ref[...], _DN_NT,
                                    preferred_element_type=jnp.float32)
                  + b_ref[...])
        out_ref[...] = logits.astype(out_ref.dtype)


def _token_sum_kernel_partial(hid_ref, part_ref, acc_ref):
    """grid = (seq_slice, batch_block, layer, seq_block_within_slice).
    Emits per-slice partial token sums; the tiny epilogue runs in plain JAX.
    Used on v7x when the batch axis alone cannot feed both TensorCores."""
    l = pl.program_id(2)
    s = pl.program_id(3)

    @pl.when(jnp.logical_and(l == 0, s == 0))
    def _():
        acc_ref[...] = jnp.zeros_like(acc_ref)

    acc_ref[...] += jnp.sum(hid_ref[...], axis=1, dtype=jnp.float32)

    @pl.when(jnp.logical_and(l == pl.num_programs(2) - 1, s == pl.num_programs(3) - 1))
    def _():
        part_ref[...] = acc_ref[...]


# ---------------------------------------------------------------------------
# Tiling heuristics.
# ---------------------------------------------------------------------------
def _pick_batch_tile(B):
    # pool/out blocks: second-to-last dim must be a multiple of 8 or the full dim.
    # (A divisor of B that is a multiple of 8 only exists when 8 | B; padding the
    #  whole hidden-state slab to fix odd B would cost a full HBM copy, so fall
    #  back to tB = B in that rare case.)
    return 8 if B % 8 == 0 else B


def _pick_seq_tile(S, tB, H, itemsize, budget_bytes):
    # Largest divisor of S whose [tB, tS, H] block fits the budget and keeps the
    # packed-sublane layout dense: tS multiple of 8 (f32) / 16 (bf16) / 32 (8-bit),
    # or tS == S (full-dim exception).
    if itemsize >= 4:
        align = 8
    elif itemsize == 2:
        align = 16
    else:
        align = 32
    candidates = [d for d in range(S, 0, -1) if S % d == 0 and (d % align == 0 or d == S)]
    for d in candidates:
        if tB * d * H * itemsize <= budget_bytes:
            return d
    return candidates[-1]


# ---------------------------------------------------------------------------
# Wrapper.
# ---------------------------------------------------------------------------
def sequence_classifier_head(hidden_states, pooler, weight, bias,
                             n_layers=N_LAYERS,
                             force_tiled=None,
                             hid_block_budget_bytes=None,
                             num_cores=None):
    """hidden_states: [L_total, B, S, H] (all transformer hidden states, hidden[2]),
    pooler: [B, H] (hidden[1]), weight: [C, 2H] (torch Linear layout), bias: [C]."""
    L_total, B, S, H = hidden_states.shape
    C = weight.shape[0]
    assert weight.shape[1] == 2 * H and L_total >= n_layers

    vmem_cap, detected_cores = _tpu_memory_profile()
    budget, vmem_limit = _derive_budgets(vmem_cap, is_v7x=(detected_cores >= 2))
    if hid_block_budget_bytes is not None:
        budget = hid_block_budget_bytes
    if num_cores is None:
        num_cores = detected_cores

    # Split the Linear and fold the 1/S mean into the token-side weight:
    #   cat([mean_tok, pool]) @ W.T + b == sum_tok @ (W[:, :H]/S).T + pool @ W[:, H:].T + b
    # Weights stay in [C, H] layout (contract the last axis) so the C=2 axis only
    # sublane-pads 2->8 in VMEM instead of lane-padding 2->128.
    w32 = weight.astype(jnp.float32)
    w_tok = w32[:, :H] * jnp.float32(1.0 / S)     # [C, H]
    w_pool = w32[:, H:]                           # [C, H]
    b2 = bias.reshape(1, C).astype(jnp.float32)   # [1, C]

    itemsize = hidden_states.dtype.itemsize
    full_slab_bytes = L_total * B * S * H * itemsize
    use_tiled = (full_slab_bytes > SMALL_PATH_MAX_BYTES) if force_tiled is None else force_tiled
    layer_off = L_total - n_layers

    if not use_tiled:
        return pl.pallas_call(
            _make_small_kernel(layer_off, n_layers),
            out_shape=jax.ShapeDtypeStruct((B, C), jnp.float32),
            in_specs=[pl.BlockSpec(memory_space=pltpu.MemorySpace.VMEM)] * 5,
            out_specs=pl.BlockSpec(memory_space=pltpu.MemorySpace.VMEM),
            compiler_params=pltpu.CompilerParams(
                vmem_limit_bytes=min(vmem_limit, 32 * MiB)),
        )(hidden_states, pooler, w_tok, w_pool, b2)

    # ---- tiled streaming-reduction path -----------------------------------
    tB = _pick_batch_tile(B)
    tS = _pick_seq_tile(S, tB, H, itemsize, budget)
    batch_blocks = B // tB
    seq_blocks = S // tS

    hid_kwargs = {}
    hid_block_bytes = tB * tS * H * itemsize
    if hid_block_bytes < DEEP_BUFFER_BELOW_BYTES and n_layers * seq_blocks > 2:
        # Small streaming blocks: per-block DMA shrinks toward fixed issue/wait
        # latency, so go 3-deep.  Large blocks keep default double-buffering.
        hid_kwargs["pipeline_mode"] = pl.Buffered(3)

    # v7x: if the parallel batch axis can't feed both TensorCores, split the seq
    # reduction across cores (partial token sums per slice) and combine the tiny
    # partials + epilogue outside the kernel.  No-op on single-core chips.
    use_seq_split = (num_cores >= 2 and batch_blocks < num_cores
                     and seq_blocks >= num_cores and seq_blocks % num_cores == 0)

    if use_seq_split:
        P = num_cores
        n_sb = seq_blocks // P
        hid_spec = pl.BlockSpec(
            (None, tB, tS, H),
            lambda p, b, l, s: (l + layer_off, b, p * n_sb + s, 0),
            **hid_kwargs)
        part_spec = pl.BlockSpec((None, tB, H), lambda p, b, l, s: (p, b, 0))
        partial = pl.pallas_call(
            _token_sum_kernel_partial,
            out_shape=jax.ShapeDtypeStruct((P, B, H), jnp.float32),
            grid_spec=pltpu.PrefetchScalarGridSpec(
                num_scalar_prefetch=0,
                grid=(P, batch_blocks, n_layers, n_sb),
                in_specs=[hid_spec],
                out_specs=part_spec,
                scratch_shapes=[pltpu.VMEM((tB, H), jnp.float32)]),
            compiler_params=pltpu.CompilerParams(
                dimension_semantics=("parallel", "parallel", "arbitrary", "arbitrary"),
                vmem_limit_bytes=vmem_limit),
        )(hidden_states)
        token_sum = jnp.sum(partial, axis=0)                       # [B, H]
        return (token_sum @ w_tok.T
                + pooler.astype(jnp.float32) @ w_pool.T
                + b2)

    hid_spec = pl.BlockSpec((None, tB, tS, H),
                            lambda b, l, s: (l + layer_off, b, s, 0), **hid_kwargs)
    pool_spec = pl.BlockSpec((tB, H), lambda b, l, s: (b, 0))      # resident per batch block
    w_tok_spec = pl.BlockSpec((C, H), lambda b, l, s: (0, 0))      # fetched once, stays resident
    w_pool_spec = pl.BlockSpec((C, H), lambda b, l, s: (0, 0))
    b_spec = pl.BlockSpec((1, C), lambda b, l, s: (0, 0))
    out_spec = pl.BlockSpec((tB, C), lambda b, l, s: (b, 0))

    return pl.pallas_call(
        _head_kernel_tiled,
        out_shape=jax.ShapeDtypeStruct((B, C), jnp.float32),
        grid_spec=pltpu.PrefetchScalarGridSpec(
            num_scalar_prefetch=0,
            grid=(batch_blocks, n_layers, seq_blocks),             # reduction axes last
            in_specs=[hid_spec, pool_spec, w_tok_spec, w_pool_spec, b_spec],
            out_specs=out_spec,
            scratch_shapes=[pltpu.VMEM((tB, H), jnp.float32)]),
        compiler_params=pltpu.CompilerParams(
            dimension_semantics=("parallel", "arbitrary", "arbitrary"),
            vmem_limit_bytes=vmem_limit),
    )(hidden_states, pooler, w_tok, w_pool, b2)


def cross_entropy(logits, labels):
    # Optional classification loss (plain-JAX glue, matches torch CrossEntropyLoss mean).
    logp = jax.nn.log_softmax(logits, axis=-1)
    return -jnp.mean(jnp.take_along_axis(logp, labels[:, None], axis=-1))


if __name__ == "__main__":
    key = jax.random.PRNGKey(0)
    (k_hid, k_pool, k_w, k_b, k_lbl,
     k_hid2, k_pool2, k_w2, k_b2,
     k_hid3, k_pool3, k_w3, k_b3) = jax.random.split(key, 13)

    # ---- Case 1: tiny shapes -> no-grid fast path --------------------------
    B, S, H = 2, 8, 32
    L_TOTAL = 5          # embeddings + 4 encoder layers of hidden states
    # TODO(synk): the wrapped transformer forward and the attention-mask-derived
    # max_length truncation are external / dynamic-shaped and not reproduced
    # in-kernel; hidden_states/pooler stand in for self.transformer(...) outputs.
    hidden_states = jax.random.normal(k_hid, (L_TOTAL, B, S, H), dtype=jnp.float32)
    pooler = jax.random.normal(k_pool, (B, H), dtype=jnp.float32)
    weight = jax.random.normal(k_w, (NUM_CLASSES, 2 * H), dtype=jnp.float32) * 0.05
    bias = jax.random.normal(k_b, (NUM_CLASSES,), dtype=jnp.float32) * 0.05
    labels = jax.random.randint(k_lbl, (B,), 0, NUM_CLASSES)

    logits = jax.block_until_ready(
        sequence_classifier_head(hidden_states, pooler, weight, bias))
    loss = jax.block_until_ready(cross_entropy(logits, labels))

    tok = jnp.mean(jnp.sum(hidden_states[-N_LAYERS:], axis=0), axis=1)     # [B, H]
    ref = jnp.concatenate([tok, pooler], axis=1) @ weight.T + bias
    np.testing.assert_allclose(np.asarray(logits), np.asarray(ref), rtol=1e-5, atol=1e-5)
    assert np.isfinite(float(loss))

    # ---- Case 2: bf16, forced tiled streaming path (multi-block reductions) -
    B2, S2, H2, L2 = 16, 128, 128, 5
    hs2 = jax.random.normal(k_hid2, (L2, B2, S2, H2), dtype=jnp.float32).astype(jnp.bfloat16)
    pool2 = jax.random.normal(k_pool2, (B2, H2), dtype=jnp.float32).astype(jnp.bfloat16)
    w2 = jax.random.normal(k_w2, (NUM_CLASSES, 2 * H2), dtype=jnp.float32) * 0.05
    b2v = jax.random.normal(k_b2, (NUM_CLASSES,), dtype=jnp.float32) * 0.05

    logits2 = jax.block_until_ready(
        sequence_classifier_head(hs2, pool2, w2, b2v,
                                 force_tiled=True,
                                 hid_block_budget_bytes=64 * 1024))

    hs2_f = hs2.astype(jnp.float32)
    tok2 = jnp.mean(jnp.sum(hs2_f[-N_LAYERS:], axis=0), axis=1)            # [B2, H2]
    ref2 = jnp.concatenate([tok2, pool2.astype(jnp.float32)], axis=1) @ w2.T + b2v
    np.testing.assert_allclose(np.asarray(logits2), np.asarray(ref2), rtol=1e-2, atol=1e-2)

    # ---- Case 3: single batch block -> forced seq-split (v7x dual-TC) path --
    B3, S3, H3, L3 = 8, 128, 128, 5
    hs3 = jax.random.normal(k_hid3, (L3, B3, S3, H3), dtype=jnp.float32).astype(jnp.bfloat16)
    pool3 = jax.random.normal(k_pool3, (B3, H3), dtype=jnp.float32).astype(jnp.bfloat16)
    w3 = jax.random.normal(k_w3, (NUM_CLASSES, 2 * H3), dtype=jnp.float32) * 0.05
    b3v = jax.random.normal(k_b3, (NUM_CLASSES,), dtype=jnp.float32) * 0.05

    logits3 = jax.block_until_ready(
        sequence_classifier_head(hs3, pool3, w3, b3v,
                                 force_tiled=True,
                                 hid_block_budget_bytes=64 * 1024,
                                 num_cores=2))

    hs3_f = hs3.astype(jnp.float32)
    tok3 = jnp.mean(jnp.sum(hs3_f[-N_LAYERS:], axis=0), axis=1)
    ref3 = jnp.concatenate([tok3, pool3.astype(jnp.float32)], axis=1) @ w3.T + b3v
    np.testing.assert_allclose(np.asarray(logits3), np.asarray(ref3), rtol=1e-2, atol=1e-2)

    print("KERNEL_OK")
</pallas_src>

<mosaic_0001>
module attributes {stable_mosaic.version = 11 : i64} {
  func.func @kernel(%arg0: memref<5x2x8x32xf32, #tpu.memory_space<vmem>>, %arg1: memref<2x32xf32, #tpu.memory_space<vmem>>, %arg2: memref<2x32xf32, #tpu.memory_space<vmem>>, %arg3: memref<2x32xf32, #tpu.memory_space<vmem>>, %arg4: memref<1x2xf32, #tpu.memory_space<vmem>>, %arg5: memref<2x2xf32, #tpu.memory_space<vmem>>) attributes {dimension_semantics = [], scalar_prefetch = 0 : i64, scratch_operands = 0 : i64, tpu.core_type = #tpu.core_type<tc>} {
    %c1 = arith.constant 1 : index
    %c0 = arith.constant 0 : index
    %c0_0 = arith.constant 0 : index
    %c0_1 = arith.constant 0 : index
    %0 = vector.load %arg0[%c1, %c0, %c0_0, %c0_1] : memref<5x2x8x32xf32, #tpu.memory_space<vmem>>, vector<4x2x8x32xf32>
    %cst = arith.constant dense<0.000000e+00> : vector<2x8x32xf32>
    %1 = vector.multi_reduction <add>, %0, %cst [0] : vector<4x2x8x32xf32> to vector<2x8x32xf32>
    %cst_2 = arith.constant dense<0.000000e+00> : vector<2x32xf32>
    %2 = vector.multi_reduction <add>, %1, %cst_2 [1] : vector<2x8x32xf32> to vector<2x32xf32>
    %c0_3 = arith.constant 0 : index
    %c0_4 = arith.constant 0 : index
    %3 = vector.load %arg1[%c0_3, %c0_4] : memref<2x32xf32, #tpu.memory_space<vmem>>, vector<2x32xf32>
    %c0_5 = arith.constant 0 : index
    %c0_6 = arith.constant 0 : index
    %4 = vector.load %arg2[%c0_5, %c0_6] : memref<2x32xf32, #tpu.memory_space<vmem>>, vector<2x32xf32>
    %cst_7 = arith.constant dense<0.000000e+00> : vector<2x2xf32>
    %5 = tpu.matmul %2, %4, %cst_7 {dimension_numbers = #tpu.dot_dimension_numbers<[1], [1], [0], [0], [0, 0, 1, 0], [], []>} : vector<2x32xf32>, vector<2x32xf32>, vector<2x2xf32> -> vector<2x2xf32>
    %c0_8 = arith.constant 0 : index
    %c0_9 = arith.constant 0 : index
    %6 = vector.load %arg3[%c0_8, %c0_9] : memref<2x32xf32, #tpu.memory_space<vmem>>, vector<2x32xf32>
    %cst_10 = arith.constant dense<0.000000e+00> : vector<2x2xf32>
    %7 = tpu.matmul %3, %6, %cst_10 {dimension_numbers = #tpu.dot_dimension_numbers<[1], [1], [0], [0], [0, 0, 1, 0], [], []>} : vector<2x32xf32>, vector<2x32xf32>, vector<2x2xf32> -> vector<2x2xf32>
    %8 = arith.addf %5, %7 : vector<2x2xf32>
    %c0_11 = arith.constant 0 : index
    %c0_12 = arith.constant 0 : index
    %9 = vector.load %arg4[%c0_11, %c0_12] : memref<1x2xf32, #tpu.memory_space<vmem>>, vector<1x2xf32>
    %10 = vector.broadcast %9 : vector<1x2xf32> to vector<2x2xf32>
    %11 = arith.addf %8, %10 : vector<2x2xf32>
    %c0_13 = arith.constant 0 : index
    %c0_14 = arith.constant 0 : index
    %12 = vector.load %arg5[%c0_13, %c0_14] : memref<2x2xf32, #tpu.memory_space<vmem>>, vector<2x2xf32>
    tpu.vector_store %arg5[%c0_13, %c0_14], %11 {strides = array<i32>} : memref<2x2xf32, #tpu.memory_space<vmem>>, vector<2x2xf32>,
    return
  }
}

</mosaic_0001>

<bundles_post_ra>
// kernel: tpu_custom_call.1
= control target key start
LH: loop header
LB: loop body
LE: loop exit
PB: predicated region body
PF: predicated region fallthrough
CT: control target
= control target key end

     0   :  { %10 = vsyncpa [#allocation3], 0  ;;  %s430_s0 = inlined_call_operand.hbm [shape: f32[5,2,8,32], index: 0, kind: input, shape index: {}]   ;;  %s431_s1 = inlined_call_operand.hbm [shape: f32[2,32], index: 1, kind: input, shape index: {}]   ;;  %s432_s2 = inlined_call_operand.vmem [shape: f32[2,32], index: 2, kind: input, shape index: {}]   ;;  %s433_s3 = inlined_call_operand.vmem [shape: f32[2,32], index: 3, kind: input, shape index: {}]   ;;  %s434_s4 = inlined_call_operand.vmem [shape: f32[1,2], index: 4, kind: input, shape index: {}]   ;;  %s435_s5 = inlined_call_operand.hbm [shape: f32[2,2], index: 5, kind: output, shape index: {}]  }
   0x1   :  { %11 = vsyncpa [#allocation6], 0 }
   0x2   :  { %12 = vsyncpa [#allocation4], 0  ;;  %s361_s18 = smov [#allocation2]  }
   0x3   :  { %s18_s19 = sshll.u32 %s361_s18, 4  ;;  %s19_s19 = int_to_ptr.vmem [resolvable:$true] %s18_s19 }
   0x4   :  { %s303_s20 = scalar_lea.vmem %s19_s19, 1280  ;;  %p308_p1 = scmp.lt.s32.totalorder %s19_s19, %s19_s19 }
   0x5   :  { %p304_p0 = scmp.ne.s32.totalorder %s19_s19, %s303_s20  ;;  %p309_p2 = scmp.lt.s32.totalorder %s303_s20, %s303_s20 }
   0x7   :  { %p310_p3 = por %p309_p2, %p308_p1 }
   0x9   :  { %p311_p4 = pnand %p310_p3, %p304_p0 }
   0xb   :  { %314 = shalt.err (!%p311_p4)
}
   0xc   :  { %s362_s21 = smov 128   ;;  %s363_s22 = smov 8  }
   0xd   :  { %24 = dma.hbm_to_vmem [thread:$0]  %s430_s0, 1280, %s19_s19, [#allocation3], %s362_s21, %s362_s21, %s363_s22  }
   0xe   :  { %s364_s25 = smov [#allocation5]  }
   0xf   :  { %s31_s26 = sshll.u32 %s364_s25, 4  ;;  %s32_s26 = int_to_ptr.vmem [resolvable:$true] %s31_s26 }
  0x10   :  { %s323_s27 = scalar_lea.vmem %s32_s26, 32  ;;  %p328_p6 = scmp.lt.s32.totalorder %s32_s26, %s32_s26 }
  0x11   :  { %p324_p5 = scmp.ne.s32.totalorder %s32_s26, %s323_s27  ;;  %p329_p7 = scmp.lt.s32.totalorder %s323_s27, %s323_s27 }
  0x13   :  { %p330_p8 = por %p329_p7, %p328_p6 }
  0x15   :  { %p331_p9 = pnand %p330_p8, %p324_p5 }
  0x17   :  { %334 = shalt.err (!%p331_p9)
}
  0x18   :  { %34 = dma.hbm_to_vmem [thread:$0]  %s431_s1, 32, %s32_s26, [#allocation6]  }
  0x19   :  { %355 = dma.done.wait [#allocation3], 1280  }
  0x1a   :  { %356 = vsyncadd [#allocation3], 4294966016 }
  0x1b   :  { %357 = dma.done.wait [#allocation6], 32  }
  0x1c   :  { %358 = vsyncadd [#allocation6], 4294967264  ;;  %v365_v0 = vmov 0.0   ;;  %vm366_vm0 = vmmov 0   ;;  %vm56_vm1 = vcmask 261120   ;;  %v48_v4 = vld [vmem:[#allocation2 + $0x10] sm:$0xff] }
  0x1d   :  { %278 = vmatprep.subr.mxu0 %v365_v0  ;;  %283 = vmatprep.subr.mxu1 %v365_v0  ;;  %v87_v1 = vld [vmem:[%s433_s3] sm:$0x3]  ;;  %v85_v3 = vld [vmem:[#allocation5] sm:$0x3]  ;;  %v49_v5 = vld [vmem:[#allocation2 + $0x18] sm:$0xff]  ;;  %v57_v10 = vsel %vm56_vm1, %v48_v4, 0.0 }
  0x1e   :  { %280 = vmatprep.mubr.msk.f32.mxu0 %vm366_vm0, %v365_v0  ;;  %285 = vmatprep.mubr.msk.f32.mxu1 %vm366_vm0, %v365_v0  ;;  %v86_v2 = vld [vmem:[%s432_s2] sm:$0x3]  ;;  %v51_v7 = vld [vmem:[#allocation2 + $0x28] sm:$0xff]  ;;  %v52_v8 = vld [vmem:[#allocation2 + $0x30] sm:$0xff]  ;;  %v64_v12 = vsel %vm56_vm1, %v49_v5, 0.0  ;;  %vm166_vm2 = vcmask 1041409  }
  0x1f   :  { %279 = vmatpush3.xpose.msk.msra.mxu0 %vm56_vm1, %v87_v1  ;;  %284 = vmatpush3.xpose.msk.msra.mxu1 %vm56_vm1, %v86_v2  ;;  %v50_v6 = vld [vmem:[#allocation2 + $0x20] sm:$0xff]  ;;  %v53_v9 = vld [vmem:[#allocation2 + $0x38] sm:$0xff]  ;;  %v55_v14 = vld [vmem:[#allocation2 + $0x48] sm:$0xff]  ;;  %v60_v16 = vsel %vm56_vm1, %v52_v8, 0.0  ;;  %v65_v17 = vsel %vm56_vm1, %v51_v7, 0.0  ;;  %s367_s3 = smov [#allocation7]  }
  0x20   :  { %v58_v11 = vsel %vm56_vm1, %v50_v6, 0.0  ;;  %v54_v13 = vld [vmem:[#allocation2 + $0x40] sm:$0xff]  ;;  %v67_v18 = vsel %vm56_vm1, %v53_v9, 0.0  ;;  %v66_v20 = vadd.f32 %v65_v17, %v64_v12  ;;  %v69_v22 = vsel %vm56_vm1, %v55_v14, 0.0  ;;  %s259_s8 = sshll.u32 %s367_s3, 4  ;;  %s260_s8 = int_to_ptr.vmem [resolvable:$true] %s259_s8 }
  0x21   :  { %v59_v15 = vadd.f32 %v58_v11, %v57_v10  ;;  %v62_v19 = vsel %vm56_vm1, %v54_v13, 0.0  ;;  %v273_v44 = vld [vmem:[%s434_s4] ss:$0 sm:$0xff]  ;;  %vm251_vm3 = vcmask 9216   ;;  %s335_s9 = scalar_lea.vmem %s260_s8, 32  ;;  %p340_p11 = scmp.lt.s32.totalorder %s260_s8, %s260_s8 }
  0x22   :  { %281 = vmatmul.mubr.msk.f32.vlgmr.msra.gmra.mxu0 %vm56_vm1, %v85_v3  ;;  %v68_v23 = vadd.f32 %v67_v18, %v66_v20  ;;  %p336_p10 = scmp.ne.s32.totalorder %s260_s8, %s335_s9  ;;  %p341_p12 = scmp.lt.s32.totalorder %s335_s9, %s335_s9 }
  0x23   :  { %v61_v21 = vadd.f32 %v60_v16, %v59_v15 }
  0x24   :  { %v70_v25 = vadd.f32 %v69_v22, %v68_v23  ;;  %p342_p13 = por %p341_p12, %p340_p11 }
  0x25   :  { %v63_v24 = vadd.f32 %v62_v19, %v61_v21 }
  0x26   :  { %v78_v28 = vsel %vm56_vm1, %v70_v25, 0.0  ;;  %p343_p0 = pnand %p342_p13, %p336_p10 }
  0x27   :  { %v71_v26 = vsel %vm56_vm1, %v63_v24, 0.0  ;;  %v79_v29 = vrot.slane %v78_v28, 4 }
  0x28   :  { %v72_v27 = vrot.slane %v71_v26, 4 }
  0x29   :  { %v80_v31 = vadd.f32 %v79_v29, %v78_v28 }
  0x2a   :  { %v73_v30 = vadd.f32 %v72_v27, %v71_v26 }
  0x2b   :  { %v81_v33 = vrot.slane %v80_v31, 2 }
  0x2c   :  { %v74_v32 = vrot.slane %v73_v30, 2 }
  0x2d   :  { %v82_v35 = vadd.f32 %v81_v33, %v80_v31 }
  0x2e   :  { %v75_v34 = vadd.f32 %v74_v32, %v73_v30 }
  0x2f   :  { %v83_v37 = vrot.slane %v82_v35, 1 }
  0x30   :  { %v76_v36 = vrot.slane %v75_v34, 1 }
  0x31   :  { %v84_v39 = vadd.f32 %v83_v37, %v82_v35 }
  0x32   :  { %v77_v38 = vadd.f32 %v76_v36, %v75_v34 }
  0x34   :  { %v167_v40 = vsel %vm166_vm2, %v84_v39, %v77_v38 }
  0x35   :  { %286 = vmatmul.mubr.msk.f32.vlgmr.msra.gmra.mxu1 %vm56_vm1, %v167_v40 }
  0xe2   :  { %v160_v41 = vpop.f32.mrf.mxu0 }
  0xe4   :  { %v282_v42 = vpop.f32.mrf.mxu0 }
  0xf5   :  { %v239_v43 = vpop.f32.mrf.mxu1 }
  0xf6   :  { %v240_v45 = vadd.f32 %v239_v43, %v160_v41 }
  0xf7   :  { %v287_v46 = vpop.f32.mrf.mxu1 }
  0xf8   :  { %v250_v47 = vadd.f32 %v273_v44, %v240_v45 }
  0xfa   :  { %252 = vst.msk [vmem:[#allocation7] sm:$0x3] %vm251_vm3, %v250_v47 }
  0xfb   :  { %346 = shalt.err (!%p343_p0)
}
  0xfc   :  { %262 = dma.vmem_to_hbm [thread:$0]  %s260_s8, 32, %s435_s5, [#allocation4]  }
  0xfd   :  { %359 = dma.done.wait [#allocation4], 32  }
  0xfe   :  { %360 = vsyncadd [#allocation4], 4294967264 }
  0xff   :  { %266 = vsyncpa [#allocation3], 1 }
 0x100   :  { %267 = vsyncpa [#allocation6], 1 }
 0x101   :  { %268 = vsyncpa [#allocation4], 1 }

</bundles_post_ra>
